<compile_context>
chip_gen: v6e
topology: v6e:2x2x1
jax: 0.10.0
libtpu: 0.0.40
codegen_flags: <defaults>
</compile_context>

<pallas_src>
import jax
import jax.numpy as jnp
from jax.experimental import pallas as pl
from jax.experimental.pallas import tpu as pltpu


_LANES = 1024   # lane-dense width: large multiple of 128
_TM_MAX = 512   # rows per tile -> (512, 1024) f32 tile = 2 MiB


def _scale_kernel(scale_ref, x_ref, o_ref):
    # scale_ref: SMEM (1,) scalar; x_ref / o_ref: VMEM (tm, _LANES) tiles.
    s = scale_ref[0].astype(x_ref.dtype)   # dtype-stable multiply (bf16-safe)
    o_ref[...] = x_ref[...] * s


def scale_layer(x: jax.Array, scale: jax.Array) -> jax.Array:
    """Pallas implementation of ScaleLayer.forward.

    x:     arbitrary-shape activation tensor (NCHW in the PyTorch module)
    scale: (1, 1, 1, 1) broadcast scalar parameter
    """
    orig_shape = x.shape
    total = x.size

    # Lane-dense 2-D view: (rows_padded, 1024). Pad tail so the lane axis is a
    # clean multiple of 128 and every grid block is full.
    rows = pl.cdiv(total, _LANES)
    tm = min(_TM_MAX, rows)                      # small inputs: one full-height tile
    rows_padded = pl.cdiv(rows, tm) * tm
    padded_total = rows_padded * _LANES

    flat = x.reshape(-1)
    if padded_total != total:
        flat = jnp.pad(flat, (0, padded_total - total))
    x2 = flat.reshape(rows_padded, _LANES)

    scale_flat = scale.reshape(-1)[:1]           # (1,) scalar, lives in SMEM

    grid = (rows_padded // tm,)

    out2 = pl.pallas_call(
        _scale_kernel,
        out_shape=jax.ShapeDtypeStruct(x2.shape, x.dtype),
        grid=grid,
        in_specs=[
            pl.BlockSpec(memory_space=pltpu.MemorySpace.SMEM),   # scalar scale
            pl.BlockSpec((tm, _LANES), lambda i: (i, 0)),        # activation tile
        ],
        out_specs=pl.BlockSpec((tm, _LANES), lambda i: (i, 0)),
        compiler_params=pltpu.CompilerParams(
            dimension_semantics=("parallel",),   # lets v7x shard tiles across both TCs
        ),
    )(scale_flat, x2)

    out = out2.reshape(-1)
    if padded_total != total:
        out = out[:total]
    return out.reshape(orig_shape)


if __name__ == "__main__":
    key = jax.random.PRNGKey(0)

    # Deterministic parameter init, matching ScaleLayer.__init__:
    # scale = ones((1,1,1,1)) * init_value, with init_value = 1
    init_value = 1.0
    scale = jnp.ones((1, 1, 1, 1), dtype=jnp.float32) * init_value

    # --- main small NCHW example (matches the module's conv-style usage) ---
    x = jax.random.normal(key, (2, 4, 16, 16), dtype=jnp.float32)
    out = jax.block_until_ready(scale_layer(x, scale))
    ref = x * scale
    assert out.shape == x.shape and out.dtype == x.dtype
    assert jnp.allclose(out, ref), "mismatch vs reference (small NCHW)"

    # --- non-trivial scale + ragged element count (exercises tail padding) ---
    scale2 = jnp.full((1, 1, 1, 1), 1.7, dtype=jnp.float32)
    k1, k2 = jax.random.split(key)
    x_odd = jax.random.normal(k1, (2, 3, 7, 7), dtype=jnp.float32)
    out_odd = jax.block_until_ready(scale_layer(x_odd, scale2))
    assert jnp.allclose(out_odd, x_odd * scale2), "mismatch vs reference (padded tail)"

    # --- larger input (exercises the multi-tile, pipelined grid path) ---
    x_big = jax.random.normal(k2, (8, 16, 96, 96), dtype=jnp.float32)
    out_big = jax.block_until_ready(scale_layer(x_big, scale2))
    assert jnp.allclose(out_big, x_big * scale2), "mismatch vs reference (tiled path)"

    # --- bf16 activations (exercises the dtype-stable scalar cast) ---
    x_bf16 = jax.random.normal(k1, (2, 4, 16, 16), dtype=jnp.bfloat16)
    scale_half = jnp.full((1, 1, 1, 1), 0.5, dtype=jnp.float32)
    out_bf16 = jax.block_until_ready(scale_layer(x_bf16, scale_half))
    assert out_bf16.dtype == jnp.bfloat16
    assert jnp.allclose(out_bf16.astype(jnp.float32),
                        x_bf16.astype(jnp.float32) * 0.5), "mismatch vs reference (bf16)"

    print("KERNEL_OK")
</pallas_src>

<mosaic_0001>
module attributes {stable_mosaic.version = 11 : i64} {
  func.func @_scale_kernel(%arg0: i32, %arg1: memref<1xf32, #tpu.memory_space<smem>>, %arg2: memref<2x1024xf32, #tpu.memory_space<vmem>>, %arg3: memref<2x1024xf32, #tpu.memory_space<vmem>>) attributes {dimension_semantics = [#tpu.dimension_semantics<parallel>], iteration_bounds = array<i64: 1>, scalar_prefetch = 0 : i64, scratch_operands = 0 : i64, tpu.core_type = #tpu.core_type<tc>, window_params = [{transform_indices = @transform_0, window_bounds = array<i64: 1>}, {transform_indices = @transform_1, window_bounds = array<i64: 2, 1024>}, {transform_indices = @transform_2, window_bounds = array<i64: 2, 1024>}]} {
    %c0 = arith.constant 0 : index
    %0 = memref.load %arg1[%c0] : memref<1xf32, #tpu.memory_space<smem>>
    %c0_0 = arith.constant 0 : index
    %c0_1 = arith.constant 0 : index
    %1 = vector.load %arg2[%c0_0, %c0_1] : memref<2x1024xf32, #tpu.memory_space<vmem>>, vector<2x1024xf32>
    %2 = vector.broadcast %0 : f32 to vector<2x1024xf32>
    %3 = arith.mulf %1, %2 : vector<2x1024xf32>
    %c0_2 = arith.constant 0 : index
    %c0_3 = arith.constant 0 : index
    %4 = vector.load %arg3[%c0_2, %c0_3] : memref<2x1024xf32, #tpu.memory_space<vmem>>, vector<2x1024xf32>
    tpu.vector_store %arg3[%c0_2, %c0_3], %3 {strides = array<i32>} : memref<2x1024xf32, #tpu.memory_space<vmem>>, vector<2x1024xf32>,
    return
  }
  func.func @transform_0(%arg0: i32) -> i32 {
    %c0_i32 = arith.constant 0 : i32
    %c0_i32_0 = arith.constant 0 : i32
    return %c0_i32 : i32
  }
  func.func @transform_1(%arg0: i32) -> (i32, i32) {
    %c0_i32 = arith.constant 0 : i32
    %c0_i32_0 = arith.constant 0 : i32
    return %arg0, %c0_i32 : i32, i32
  }
  func.func @transform_2(%arg0: i32) -> (i32, i32) {
    %c0_i32 = arith.constant 0 : i32
    %c0_i32_0 = arith.constant 0 : i32
    return %arg0, %c0_i32 : i32, i32
  }
}

</mosaic_0001>

<bundles_post_ra>
// kernel: tpu_custom_call.1
= control target key start
LH: loop header
LB: loop body
LE: loop exit
PB: predicated region body
PF: predicated region fallthrough
CT: control target
= control target key end

     0   :  { %8 = vsyncpa [#allocation4], 0  ;;  %s120_s0 = inlined_call_operand.<no memory space> [shape: f32[1], index: 0, kind: input, shape index: {}]   ;;  %s121_s1 = inlined_call_operand.hbm [shape: f32[2,1024], index: 1, kind: input, shape index: {}]   ;;  %s122_s2 = inlined_call_operand.hbm [shape: f32[2,1024], index: 2, kind: output, shape index: {}]  }
   0x1   :  { %9 = vsyncpa [#allocation5], 0  ;;  %s94_s9 = smov [#allocation3]  }
   0x2   :  { %s18_s10 = sshll.u32 %s94_s9, 4  ;;  %s19_s10 = int_to_ptr.vmem [resolvable:$true] %s18_s10 }
   0x3   :  { %s58_s11 = scalar_lea.vmem %s19_s10, 256  ;;  %p63_p1 = scmp.lt.s32.totalorder %s19_s10, %s19_s10 }
   0x4   :  { %p59_p0 = scmp.ne.s32.totalorder %s19_s10, %s58_s11  ;;  %p64_p2 = scmp.lt.s32.totalorder %s58_s11, %s58_s11 }
   0x6   :  { %p65_p3 = por %p64_p2, %p63_p1 }
   0x8   :  { %p66_p4 = pnand %p65_p3, %p59_p0 }
   0xa   :  { %69 = shalt.err (!%p66_p4)
}
   0xb   :  { %21 = dma.hbm_to_vmem [thread:$0]  %s121_s1, 256, %s19_s10, [#allocation4]  }
   0xc   :  { %90 = dma.done.wait [#allocation4], 256  }
   0xd   :  { %91 = vsyncadd [#allocation4], 4294967040  ;;  %v28_v0 = vstv %s120_s0  ;;  %s95_s16 = smov [#allocation6]   ;;  %v26_v1 = vld [vmem:[#allocation3] sm:$0xff]  ;;  %v27_v2 = vld [vmem:[#allocation3 + $0x8] sm:$0xff] }
   0xe   :  { %s39_s17 = sshll.u32 %s95_s16, 4  ;;  %v29_v3 = vmul.f32 %v28_v0, %v26_v1  ;;  %v30_v4 = vmul.f32 %v28_v0, %v27_v2  ;;  %s40_s17 = int_to_ptr.vmem [resolvable:$true] %s39_s17 }
   0xf   :  { %s70_s18 = scalar_lea.vmem %s40_s17, 256  ;;  %p75_p6 = scmp.lt.s32.totalorder %s40_s17, %s40_s17 }
  0x10   :  { %31 = vst [vmem:[#allocation6] sm:$0xff] %v29_v3  ;;  %32 = vst [vmem:[#allocation6 + $0x8] sm:$0xff] %v30_v4  ;;  %p71_p5 = scmp.ne.s32.totalorder %s40_s17, %s70_s18  ;;  %p76_p7 = scmp.lt.s32.totalorder %s70_s18, %s70_s18 }
  0x12   :  { %p77_p8 = por %p76_p7, %p75_p6 }
  0x14   :  { %p78_p9 = pnand %p77_p8, %p71_p5 }
  0x16   :  { %81 = shalt.err (!%p78_p9)
}
  0x17   :  { %42 = dma.vmem_to_hbm [thread:$0]  %s40_s17, 256, %s122_s2, [#allocation5]  }
  0x18   :  { %92 = dma.done.wait [#allocation5], 256  }
  0x19   :  { %93 = vsyncadd [#allocation5], 4294967040 }
  0x1a   :  { %46 = vsyncpa [#allocation4], 1 }
  0x1b   :  { %47 = vsyncpa [#allocation5], 1 }

</bundles_post_ra>
